<compile_context>
chip_gen: v5e
topology: v5e:2x2
jax: 0.10.0
libtpu: 0.0.40
codegen_flags: <defaults>
</compile_context>

<pallas_src>
import functools

import jax
import jax.numpy as jnp
from jax.experimental import pallas as pl
from jax.experimental.pallas import tpu as pltpu


_LANE = 128     # vreg lane width (last dim)
_SUBLANE = 8    # f32 sublane packing (second-to-last dim)


def _round_up(n, m):
    return ((n + m - 1) // m) * m


def _probe_single_buffer():
    """Resolve pipeline_mode=pl.Buffered(1) support once at import time."""
    try:
        pl.BlockSpec((_SUBLANE, _LANE), lambda i: (0, 0),
                     pipeline_mode=pl.Buffered(1))
        return True
    except (AttributeError, TypeError, ValueError):
        return False


_HAS_SINGLE_BUFFER = _probe_single_buffer()


def _mlp_kernel(x_ref, w1_ref, b1_ref, w2_ref, b2_ref, o_ref):
    # fc1: bf16 x bf16 -> f32 accumulate on the MXU; bias add + ReLU in f32.
    h = jnp.dot(x_ref[...], w1_ref[...], preferred_element_type=jnp.float32)
    h = jnp.maximum(h + b1_ref[...], 0.0)
    # fc2: cast the ReLU output back to the compute dtype so both MXU
    # operands are bf16; accumulate in f32; bias add in f32.
    out = jnp.dot(h.astype(w2_ref.dtype), w2_ref[...],
                  preferred_element_type=jnp.float32)
    o_ref[...] = (out + b2_ref[...]).astype(o_ref.dtype)


def prepare_params(w1, b1, w2, b2, *, compute_dtype=jnp.bfloat16):
    """Pad weights/biases lane-dense and cast weights to compute_dtype ONCE.

    w1: (In, H)   b1: (H,)   w2: (H, Out)   b2: (Out,)
    (weights stored pre-transposed as (in_features, out_features)).
    Returns (w1_p, b1_p, w2_p, b2_p, out_features).
    """
    In, H = w1.shape
    H2, Out = w2.shape
    assert H == H2 and b1.shape == (H,) and b2.shape == (Out,), "bad param shapes"

    In_p = _round_up(In, _LANE)
    H_p = _round_up(H, _LANE)
    Out_p = _round_up(Out, _LANE)

    w1_p = jnp.pad(w1.astype(jnp.float32),
                   ((0, In_p - In), (0, H_p - H))).astype(compute_dtype)
    w2_p = jnp.pad(w2.astype(jnp.float32),
                   ((0, H_p - H), (0, Out_p - Out))).astype(compute_dtype)
    # Biases stay f32 (added to the f32 accumulator).
    b1_p = jnp.pad(b1.astype(jnp.float32), (0, H_p - H)).reshape(1, H_p)
    b2_p = jnp.pad(b2.astype(jnp.float32), (0, Out_p - Out)).reshape(1, Out_p)
    return w1_p, b1_p, w2_p, b2_p, Out


def _default_tile_b(B):
    B_p8 = _round_up(max(B, 1), _SUBLANE)
    if B_p8 <= _SUBLANE:
        return B_p8
    # >=2 grid steps so the "parallel" batch axis can shard across both v7x
    # TensorCores; cap at 256 (pass tile_b=512 on v6e/v5e when VMEM allows).
    return min(256, _round_up(pl.cdiv(B_p8, 2), _SUBLANE))


@functools.partial(jax.jit, static_argnames=("out_features", "tile_b"))
def _mlp_forward_jit(x, w1_p, b1_p, w2_p, b2_p, *, out_features, tile_b):
    B, In = x.shape
    In_p, H_p = w1_p.shape
    Out_p = w2_p.shape[1]
    compute_dtype = w1_p.dtype

    B_p = _round_up(B, tile_b)
    # Pad x (exact: zeros) and cast to the MXU compute dtype.
    x_p = jnp.pad(x.astype(jnp.float32),
                  ((0, B_p - B), (0, In_p - In))).astype(compute_dtype)

    grid = (B_p // tile_b,)
    bpe = jnp.dtype(compute_dtype).itemsize

    # Explicit VMEM budget: (single-buffered) weights + biases, double-buffered
    # x/out tiles, the (tile_b, H_p) f32 hidden intermediate, +25% headroom.
    w_copies = 1 if _HAS_SINGLE_BUFFER else 2
    vmem_bytes = int(1.25 * (
        w_copies * ((In_p * H_p + H_p * Out_p) * bpe + (H_p + Out_p) * 4)
        + 2 * tile_b * (In_p * bpe + Out_p * 4)
        + tile_b * H_p * 4))
    vmem_bytes = max(vmem_bytes, 16 << 20)
    # TODO(synk): for very large layers where bf16 W1+W2 exceed ~v7x's 64 MiB
    # VMEM, tile W2 over an Out grid axis instead of holding both weights
    # fully resident.

    cost = pl.CostEstimate(
        flops=2 * B_p * (In_p * H_p + H_p * Out_p),
        transcendentals=0,
        bytes_accessed=(B_p * In_p * bpe
                        + (In_p * H_p + H_p * Out_p) * bpe
                        + (H_p + Out_p) * 4
                        + B_p * Out_p * 4),
    )

    const_kwargs = (dict(pipeline_mode=pl.Buffered(1))
                    if _HAS_SINGLE_BUFFER else {})
    in_specs = [
        pl.BlockSpec((tile_b, In_p), lambda i: (i, 0)),                 # x tile
        pl.BlockSpec((In_p, H_p), lambda i: (0, 0), **const_kwargs),    # W1
        pl.BlockSpec((1, H_p), lambda i: (0, 0), **const_kwargs),       # b1
        pl.BlockSpec((H_p, Out_p), lambda i: (0, 0), **const_kwargs),   # W2
        pl.BlockSpec((1, Out_p), lambda i: (0, 0), **const_kwargs),     # b2
    ]

    out_p = pl.pallas_call(
        _mlp_kernel,
        out_shape=jax.ShapeDtypeStruct((B_p, Out_p), jnp.float32),
        grid_spec=pltpu.PrefetchScalarGridSpec(
            num_scalar_prefetch=0,
            grid=grid,
            in_specs=in_specs,
            out_specs=pl.BlockSpec((tile_b, Out_p), lambda i: (i, 0)),
        ),
        compiler_params=pltpu.CompilerParams(
            dimension_semantics=("parallel",),
            vmem_limit_bytes=vmem_bytes,
        ),
        cost_estimate=cost,
    )(x_p, w1_p, b1_p, w2_p, b2_p)

    return out_p[:B, :out_features]


def mlp_forward(x, params, *, tile_b=None):
    """Fused Linear -> ReLU -> Linear.

    x: (B, In) any float dtype (cast like `x.float()` then bf16 for the MXU).
    params: output of prepare_params().
    Returns (B, Out) float32.
    """
    w1_p, b1_p, w2_p, b2_p, out_features = params
    B = x.shape[0]
    if tile_b is None:
        tile_b = _default_tile_b(B)
    if tile_b < B and tile_b % _SUBLANE != 0:
        raise ValueError(
            f"tile_b={tile_b} must be a multiple of {_SUBLANE} or >= batch {B}")
    return _mlp_forward_jit(x, w1_p, b1_p, w2_p, b2_p,
                            out_features=out_features, tile_b=int(tile_b))


def init_params(key, input_size, hidden_size, output_size):
    """Deterministic init matching nn.Linear's U(-1/sqrt(fan_in), 1/sqrt(fan_in))."""
    k1, k2, k3, k4 = jax.random.split(key, 4)
    bound1 = 1.0 / (input_size ** 0.5)
    bound2 = 1.0 / (hidden_size ** 0.5)
    # Stored pre-transposed: (in_features, out_features)
    w1 = jax.random.uniform(k1, (input_size, hidden_size), jnp.float32,
                            minval=-bound1, maxval=bound1)
    b1 = jax.random.uniform(k2, (hidden_size,), jnp.float32,
                            minval=-bound1, maxval=bound1)
    w2 = jax.random.uniform(k3, (hidden_size, output_size), jnp.float32,
                            minval=-bound2, maxval=bound2)
    b2 = jax.random.uniform(k4, (output_size,), jnp.float32,
                            minval=-bound2, maxval=bound2)
    return w1, b1, w2, b2


if __name__ == "__main__":
    input_size, hidden_size, output_size = 32, 64, 16
    batch = 8

    key = jax.random.PRNGKey(0)
    kx, kp = jax.random.split(key)
    x = jax.random.normal(kx, (batch, input_size), jnp.float32)
    w1, b1, w2, b2 = init_params(kp, input_size, hidden_size, output_size)
    params = prepare_params(w1, b1, w2, b2)

    out = jax.block_until_ready(mlp_forward(x, params))

    # Pure-JAX f32 reference (bf16 operands -> relaxed tolerance; accumulation
    # stays f32 so error remains small).
    ref = jnp.maximum(x @ w1 + b1, 0.0) @ w2 + b2
    assert out.shape == (batch, output_size)
    assert jnp.allclose(out, ref, atol=5e-2, rtol=5e-2), \
        float(jnp.max(jnp.abs(out - ref)))

    # Exercise the multi-step grid path (double-buffered x/out DMA, megacore).
    xb = jax.random.normal(kx, (512, input_size), jnp.float32)
    outb = jax.block_until_ready(mlp_forward(xb, params, tile_b=128))
    refb = jnp.maximum(xb @ w1 + b1, 0.0) @ w2 + b2
    assert outb.shape == (512, output_size)
    assert jnp.allclose(outb, refb, atol=5e-2, rtol=5e-2), \
        float(jnp.max(jnp.abs(outb - refb)))

    print("KERNEL_OK")
</pallas_src>

<mosaic_0001>
module attributes {stable_mosaic.version = 11 : i64} {
  func.func @_mlp_kernel(%arg0: i32, %arg1: memref<8x128xbf16, #tpu.memory_space<vmem>>, %arg2: memref<128x128xbf16, #tpu.memory_space<vmem>>, %arg3: memref<1x128xf32, #tpu.memory_space<vmem>>, %arg4: memref<128x128xbf16, #tpu.memory_space<vmem>>, %arg5: memref<1x128xf32, #tpu.memory_space<vmem>>, %arg6: memref<8x128xf32, #tpu.memory_space<vmem>>) attributes {dimension_semantics = [#tpu.dimension_semantics<parallel>], iteration_bounds = array<i64: 1>, scalar_prefetch = 0 : i64, scratch_operands = 0 : i64, tpu.core_type = #tpu.core_type<tc>, window_params = [{transform_indices = @transform_0, window_bounds = array<i64: 8, 128>}, {pipeline_mode = #tpu.pipeline_mode<synchronous>, transform_indices = @transform_1, window_bounds = array<i64: 128, 128>}, {pipeline_mode = #tpu.pipeline_mode<synchronous>, transform_indices = @transform_2, window_bounds = array<i64: 1, 128>}, {pipeline_mode = #tpu.pipeline_mode<synchronous>, transform_indices = @transform_3, window_bounds = array<i64: 128, 128>}, {pipeline_mode = #tpu.pipeline_mode<synchronous>, transform_indices = @transform_4, window_bounds = array<i64: 1, 128>}, {transform_indices = @transform_5, window_bounds = array<i64: 8, 128>}]} {
    %c0 = arith.constant 0 : index
    %c0_0 = arith.constant 0 : index
    %0 = vector.load %arg1[%c0, %c0_0] : memref<8x128xbf16, #tpu.memory_space<vmem>>, vector<8x128xbf16>
    %c0_1 = arith.constant 0 : index
    %c0_2 = arith.constant 0 : index
    %1 = vector.load %arg2[%c0_1, %c0_2] : memref<128x128xbf16, #tpu.memory_space<vmem>>, vector<128x128xbf16>
    %cst = arith.constant dense<0.000000e+00> : vector<8x128xf32>
    %2 = tpu.matmul %0, %1, %cst {dimension_numbers = #tpu.dot_dimension_numbers<[1], [0], [0], [1], [0, 0, 1, 1], [], []>} : vector<8x128xbf16>, vector<128x128xbf16>, vector<8x128xf32> -> vector<8x128xf32>
    %c0_3 = arith.constant 0 : index
    %c0_4 = arith.constant 0 : index
    %3 = vector.load %arg3[%c0_3, %c0_4] : memref<1x128xf32, #tpu.memory_space<vmem>>, vector<1x128xf32>
    %4 = vector.broadcast %3 : vector<1x128xf32> to vector<8x128xf32>
    %5 = arith.addf %2, %4 : vector<8x128xf32>
    %cst_5 = arith.constant 0.000000e+00 : f32
    %6 = vector.broadcast %cst_5 : f32 to vector<8x128xf32>
    %7 = arith.maximumf %5, %6 : vector<8x128xf32>
    %8 = arith.truncf %7 : vector<8x128xf32> to vector<8x128xbf16>
    %c0_6 = arith.constant 0 : index
    %c0_7 = arith.constant 0 : index
    %9 = vector.load %arg4[%c0_6, %c0_7] : memref<128x128xbf16, #tpu.memory_space<vmem>>, vector<128x128xbf16>
    %cst_8 = arith.constant dense<0.000000e+00> : vector<8x128xf32>
    %10 = tpu.matmul %8, %9, %cst_8 {dimension_numbers = #tpu.dot_dimension_numbers<[1], [0], [0], [1], [0, 0, 1, 1], [], []>} : vector<8x128xbf16>, vector<128x128xbf16>, vector<8x128xf32> -> vector<8x128xf32>
    %c0_9 = arith.constant 0 : index
    %c0_10 = arith.constant 0 : index
    %11 = vector.load %arg5[%c0_9, %c0_10] : memref<1x128xf32, #tpu.memory_space<vmem>>, vector<1x128xf32>
    %12 = vector.broadcast %11 : vector<1x128xf32> to vector<8x128xf32>
    %13 = arith.addf %10, %12 : vector<8x128xf32>
    %c0_11 = arith.constant 0 : index
    %c0_12 = arith.constant 0 : index
    %14 = vector.load %arg6[%c0_11, %c0_12] : memref<8x128xf32, #tpu.memory_space<vmem>>, vector<8x128xf32>
    tpu.vector_store %arg6[%c0_11, %c0_12], %13 {strides = array<i32>} : memref<8x128xf32, #tpu.memory_space<vmem>>, vector<8x128xf32>,
    return
  }
  func.func @transform_0(%arg0: i32) -> (i32, i32) {
    %c0_i32 = arith.constant 0 : i32
    %c0_i32_0 = arith.constant 0 : i32
    return %arg0, %c0_i32 : i32, i32
  }
  func.func @transform_1(%arg0: i32) -> (i32, i32) {
    %c0_i32 = arith.constant 0 : i32
    %c0_i32_0 = arith.constant 0 : i32
    %c0_i32_1 = arith.constant 0 : i32
    return %c0_i32, %c0_i32_0 : i32, i32
  }
  func.func @transform_2(%arg0: i32) -> (i32, i32) {
    %c0_i32 = arith.constant 0 : i32
    %c0_i32_0 = arith.constant 0 : i32
    %c0_i32_1 = arith.constant 0 : i32
    return %c0_i32, %c0_i32_0 : i32, i32
  }
  func.func @transform_3(%arg0: i32) -> (i32, i32) {
    %c0_i32 = arith.constant 0 : i32
    %c0_i32_0 = arith.constant 0 : i32
    %c0_i32_1 = arith.constant 0 : i32
    return %c0_i32, %c0_i32_0 : i32, i32
  }
  func.func @transform_4(%arg0: i32) -> (i32, i32) {
    %c0_i32 = arith.constant 0 : i32
    %c0_i32_0 = arith.constant 0 : i32
    %c0_i32_1 = arith.constant 0 : i32
    return %c0_i32, %c0_i32_0 : i32, i32
  }
  func.func @transform_5(%arg0: i32) -> (i32, i32) {
    %c0_i32 = arith.constant 0 : i32
    %c0_i32_0 = arith.constant 0 : i32
    return %arg0, %c0_i32 : i32, i32
  }
}

</mosaic_0001>

<bundles_post_ra>
// kernel: _mlp_forward_jit.1
= control target key start
LH: loop header
LB: loop body
LE: loop exit
PB: predicated region body
PF: predicated region fallthrough
CT: control target
= control target key end

     0   :  { %10 = vsyncpa [#allocation3], 0  ;;  %s455_s0 = inlined_call_operand.vmem [shape: bf16[8,128], index: 0, kind: input, shape index: {}]   ;;  %s456_s1 = inlined_call_operand.hbm [shape: bf16[128,128], index: 1, kind: input, shape index: {}]   ;;  %s457_s2 = inlined_call_operand.vmem [shape: f32[1,128], index: 2, kind: input, shape index: {}]   ;;  %s458_s3 = inlined_call_operand.hbm [shape: bf16[128,128], index: 3, kind: input, shape index: {}]   ;;  %s459_s4 = inlined_call_operand.vmem [shape: f32[1,128], index: 4, kind: input, shape index: {}]   ;;  %s460_s5 = inlined_call_operand.hbm [shape: f32[8,128], index: 5, kind: output, shape index: {}]  }
   0x1   :  { %11 = vsyncpa [#allocation6], 0 }
   0x2   :  { %12 = vsyncpa [#allocation4], 0  ;;  %s19_s20 = sshll.u32 %s456_s1, 4  ;;  %s402_s21 = smov [#allocation2]   ;;  %s20_s20 = int_to_ptr.hbm [resolvable:$true] %s19_s20 }
   0x3   :  { %s21_s22 = sshll.u32 %s402_s21, 4  ;;  %s34_s25 = sshll.u32 %s458_s3, 4  ;;  %s22_s22 = int_to_ptr.vmem [resolvable:$true] %s21_s22  ;;  %s35_s25 = int_to_ptr.hbm [resolvable:$true] %s34_s25 }
   0x4   :  { %s403_s26 = smov 64   ;;  %s404_s27 = smov 4  }
   0x5   :  { %27 = dma.hbm_to_vmem [thread:$0]  %s20_s20, 1024, %s22_s22, [#allocation3], %s403_s26, %s403_s26, %s404_s27  }
   0x6   :  { %s405_s28 = smov [#allocation5]  }
   0x7   :  { %s36_s29 = sshll.u32 %s405_s28, 4  ;;  %s37_s29 = int_to_ptr.vmem [resolvable:$true] %s36_s29 }
   0x8   :  { %42 = dma.hbm_to_vmem [thread:$0]  %s35_s25, 1024, %s37_s29, [#allocation6], %s403_s26, %s403_s26, %s404_s27  }
   0x9   :  { %396 = dma.done.wait [#allocation3], 1024  }
   0xa   :  { %397 = vsyncadd [#allocation3], 4294966272 }
   0xb   :  { %398 = dma.done.wait [#allocation6], 1024  }
   0xc   :  { %399 = vsyncadd [#allocation6], 4294966272  ;;  %v308_v0 = vld [vmem:[#allocation2 + $0x38] sm:$0xff]  ;;  %v307_v1 = vld [vmem:[#allocation2 + $0x30] sm:$0xff]  ;;  %s226_s12 = sshll.u32 %s460_s5, 4  ;;  %s227_s12 = int_to_ptr.hbm [resolvable:$true] %s226_s12 }
   0xd   :  { %122 = vmatpush.bf16.msra.mxu0 %v308_v0  ;;  %v316_v2 = vld [vmem:[#allocation5 + $0x38] sm:$0xff]  ;;  %v315_v3 = vld [vmem:[#allocation5 + $0x30] sm:$0xff]  ;;  %v306_v4 = vld [vmem:[#allocation2 + $0x28] sm:$0xff] }
   0xe   :  { %205 = vmatpush.bf16.msra.mxu1 %v316_v2  ;;  %v314_v5 = vld [vmem:[#allocation5 + $0x28] sm:$0xff]  ;;  %v305_v6 = vld [vmem:[#allocation2 + $0x20] sm:$0xff]  ;;  %v304_v8 = vld [vmem:[#allocation2 + $0x18] sm:$0xff] }
   0xf   :  { %v313_v7 = vld [vmem:[#allocation5 + $0x20] sm:$0xff]  ;;  %v312_v9 = vld [vmem:[#allocation5 + $0x18] sm:$0xff]  ;;  %v303_v10 = vld [vmem:[#allocation2 + $0x10] sm:$0xff] }
  0x10   :  { %v311_v11 = vld [vmem:[#allocation5 + $0x10] sm:$0xff]  ;;  %v302_v12 = vld [vmem:[#allocation2 + $0x8] sm:$0xff]  ;;  %v301_v13 = vld [vmem:[#allocation2] sm:$0xff] }
  0x11   :  { %123 = vmatpush.bf16.msra.mxu0 %v307_v1  ;;  %v53_v14 = vld [vmem:[%s455_s0] sm:$0xf]  ;;  %v310_v15 = vld [vmem:[#allocation5 + $0x8] sm:$0xff]  ;;  %s406_s0 = smov [#allocation7]  }
  0x12   :  { %206 = vmatpush.bf16.msra.mxu1 %v315_v3  ;;  %v309_v16 = vld [vmem:[#allocation5] sm:$0xff]  ;;  %s224_s9 = sshll.u32 %s406_s0, 4  ;;  %s225_s9 = int_to_ptr.vmem [resolvable:$true] %s224_s9 }
  0x13   :  { %v322_v17 = vld [vmem:[%s457_s2] ss:$0 sm:$0xff] }
  0x14   :  { %v323_v23 = vld [vmem:[%s459_s4] ss:$0 sm:$0xff] }
  0x15   :  { %124 = vmatpush.bf16.msra.mxu0 %v306_v4 }
  0x16   :  { %207 = vmatpush.bf16.msra.mxu1 %v314_v5 }
  0x19   :  { %125 = vmatpush.bf16.msra.mxu0 %v305_v6 }
  0x1a   :  { %208 = vmatpush.bf16.msra.mxu1 %v313_v7 }
  0x1d   :  { %126 = vmatpush.bf16.msra.mxu0 %v304_v8 }
  0x1e   :  { %209 = vmatpush.bf16.msra.mxu1 %v312_v9 }
  0x21   :  { %127 = vmatpush.bf16.msra.mxu0 %v303_v10 }
  0x22   :  { %210 = vmatpush.bf16.msra.mxu1 %v311_v11 }
  0x25   :  { %128 = vmatpush.bf16.msra.mxu0 %v302_v12 }
  0x26   :  { %211 = vmatpush.bf16.msra.mxu1 %v310_v15 }
  0x29   :  { %129 = vmatpush.bf16.msra.mxu0 %v301_v13 }
  0x2a   :  { %212 = vmatpush.bf16.msra.mxu1 %v309_v16 }
  0x2c   :  { %130 = vmatmul.bf16.vlgmr.msra.gmra.mxu0 %v53_v14 }
  0xa9   :  { %v131_v18 = vpop.f32.mrf.mxu0 }
  0xaa   :  { %v132_v19 = vadd.f32 %v322_v17, %v131_v18 }
  0xac   :  { %v135_v20 = vmax.f32 %v132_v19, 0.0 }
  0xae   :  { %v136_v21 = vpack.c.bf16 %v135_v20, %v135_v20 }
  0xb0   :  { %213 = vmatmul.bf16.vlgmr.msra.gmra.mxu1 %v136_v21 }
  0xb1   :  { %v133_v22 = vpop.f32.mrf.mxu0 }
 0x12d   :  { %v214_v24 = vpop.f32.mrf.mxu1 }
 0x12e   :  { %v215_v25 = vadd.f32 %v323_v23, %v214_v24 }
 0x130   :  { %218 = vst [vmem:[#allocation7] sm:$0xff] %v215_v25 }
 0x131   :  { %229 = dma.vmem_to_hbm [thread:$0]  %s225_s9, 128, %s227_s12, [#allocation4]  }
 0x135   :  { %v216_v26 = vpop.f32.mrf.mxu1 }
 0x136   :  { %400 = dma.done.wait [#allocation4], 128  }
 0x137   :  { %401 = vsyncadd [#allocation4], 4294967168 }
 0x138   :  { %234 = vsyncpa [#allocation3], 1 }
 0x139   :  { %235 = vsyncpa [#allocation6], 1 }
 0x13a   :  { %236 = vsyncpa [#allocation4], 1 }

</bundles_post_ra>
